<compile_context>
chip_gen: v7x
topology: tpu7x:2x2x1
jax: 0.10.0
libtpu: 0.0.40
codegen_flags: <defaults>
</compile_context>

<pallas_src>
import jax
import jax.numpy as jnp
from jax.experimental import pallas as pl
from jax.experimental.pallas import tpu as pltpu


def _flatten_dma_kernel(x_hbm, out_hbm, sem):
    # Single whole-array HBM->HBM DMA; src and dst have identical (N, F) shapes.
    copy = pltpu.make_async_copy(x_hbm, out_hbm, sem)
    copy.start()
    copy.wait()


def flatten_forward(x):
    """x: (N, ...) -> (N, prod(rest)); identical to torch `x.view(x.size(0), -1)`."""
    N = x.shape[0]
    F = 1
    for d in x.shape[1:]:
        F *= d
    xf = x.reshape(N, F)                 # free relabel of a contiguous array
    nbytes = N * F * jnp.dtype(x.dtype).itemsize

    return pl.pallas_call(
        _flatten_dma_kernel,
        out_shape=jax.ShapeDtypeStruct((N, F), x.dtype),
        in_specs=[pl.BlockSpec(memory_space=pl.ANY)],
        out_specs=pl.BlockSpec(memory_space=pl.ANY),
        scratch_shapes=[pltpu.SemaphoreType.DMA(())],
        cost_estimate=pl.CostEstimate(
            flops=0, transcendentals=0, bytes_accessed=2 * nbytes),
    )(xf)


if __name__ == "__main__":
    key = jax.random.PRNGKey(0)
    k0, k1 = jax.random.split(key)

    # Spec-consistent small shape: (N, C, H, W) = (2, 4, 16, 16).
    N, C, H, W = 2, 4, 16, 16
    x = jax.random.normal(k0, (N, C, H, W), jnp.float32)
    out = jax.block_until_ready(flatten_forward(x))
    ref = x.reshape(N, -1)               # pure-JAX reference for validation
    assert out.shape == (N, C * H * W), out.shape
    assert jnp.array_equal(out, ref), float(jnp.max(jnp.abs(out - ref)))

    # Robustness check from the review: flat size with no multiple-of-128
    # divisor (F = 3*5*7 = 105).  The DMA path is layout/divisor agnostic.
    x2 = jax.random.normal(k1, (2, 3, 5, 7), jnp.float32)
    out2 = jax.block_until_ready(flatten_forward(x2))
    ref2 = x2.reshape(2, -1)
    assert out2.shape == (2, 3 * 5 * 7), out2.shape
    assert jnp.array_equal(out2, ref2)

    print("KERNEL_OK")
</pallas_src>

<mosaic_0001>
module attributes {stable_mosaic.version = 11 : i64} {
  func.func @_flatten_dma_kernel(%arg0: memref<2x1024xf32, #tpu.memory_space<any>>, %arg1: memref<2x1024xf32, #tpu.memory_space<any>>, %arg2: memref<!tpu.dma_semaphore, #tpu.memory_space<semaphore_mem>>) attributes {dimension_semantics = [], scalar_prefetch = 0 : i64, scratch_operands = 1 : i64, tpu.core_type = #tpu.core_type<tc>} {
    tpu.enqueue_dma source(%arg0 : memref<2x1024xf32, #tpu.memory_space<any>>) target(%arg1 : memref<2x1024xf32, #tpu.memory_space<any>>) target_semaphore(%arg2 : memref<!tpu.dma_semaphore, #tpu.memory_space<semaphore_mem>>)
    tpu.wait_dma2 semaphore(%arg2 : memref<!tpu.dma_semaphore, #tpu.memory_space<semaphore_mem>>) src(%arg0 : memref<2x1024xf32, #tpu.memory_space<any>>) dst(%arg1 : memref<2x1024xf32, #tpu.memory_space<any>>)
    return
  }
}

</mosaic_0001>

<bundles_post_ra>
// kernel: tpu_custom_call.1
= control target key start
LH: loop header
LB: loop body
LE: loop exit
PB: predicated region body
PF: predicated region fallthrough
CT: control target
= control target key end

     0   :  { %s35_s6 = smov [#allocation2]   ;;  %s36_s7 = smov [#allocation3]   ;;  %s54_s0 = inlined_call_operand.hbm [shape: f32[2,1024], index: 0, kind: input, shape index: {}]   ;;  %s55_s1 = inlined_call_operand.hbm [shape: f32[2,1024], index: 1, kind: output, shape index: {}]  }
   0x1   :  { %s37_s8 = smov 0  }
   0x2   :  { %18 = dma.general %s54_s0, 256, %s55_s1, %s35_s6, %s36_s7, [#allocation4], %s37_s8, 0  }
   0x3   :  { %33 = dma.done.wait [#allocation2], 256 }
   0x4   :  { %34 = vsyncadd [#allocation2], 4294967040 }
   0x5   :  { %23 = vsyncmov [#allocation2] }
   0x8   :  { %s24_s13 = vpop.sfrf %23 }
   0x9   :  { %p29_p0 = scmp.ne.s32.totalorder %s24_s13, 0 }
   0xb   :  { %28 = shalt.err (%p29_p0)  }

</bundles_post_ra>
